<compile_context>
chip_gen: v7x
topology: tpu7x:2x2x1
jax: 0.10.0
libtpu: 0.0.40
codegen_flags: <defaults>
</compile_context>

<pallas_src>
import jax
import jax.numpy as jnp
from jax.experimental import pallas as pl
from jax.experimental.pallas import tpu as pltpu


def _round_up(n, m):
    return ((n + m - 1) // m) * m


def _make_chunk_kernel(TS, T_real, mask_tail):
    """Build the per-chunk kernel (TS timesteps per grid iteration)."""

    def kernel(u_ref, c0_ref, w_in_ref, w_ctx_ref, w_out_ref,
               out_ref, x_ref, xs_ref):
        """
        u_ref    : (TS, 8, 1)       drive for this chunk / batch block (streamed)
        c0_ref   : (8, H_pad)       initial context for this batch block
        w_in_ref : (1, H_pad)       input_layer.weight.T            (resident)
        w_ctx_ref: (H_pad, H_pad)   context_layer.weight.T          (resident)
        w_out_ref: (1, H_pad)       out_layer.weight (row vector)   (resident)
        out_ref  : (1, TS, 8)       this chunk's outputs (written once per chunk)
        x_ref    : (8, H_pad)       hidden state, resident across the time axis (carry)
        xs_ref   : (TS, 8, H_pad)   VMEM scratch holding every step's hidden state
        """
        c = pl.program_id(1)   # time-chunk index ("arbitrary" axis)

        @pl.when(c == 0)
        def _init():
            x_ref[...] = c0_ref[...]

        w_in = w_in_ref[...]
        w_ctx = w_ctx_ref[...]

        # Input-layer contribution for the whole chunk in one VPU pass (independent of
        # the recurrence, so it never sits on the serial matmul->tanh chain).
        x1_all = u_ref[...] * w_in                      # (TS, 8, H_pad)

        h = x_ref[...]                                  # (8, H_pad) previous hidden
        for s in range(TS):                             # fully unrolled TS-step window
            # context_layer: Linear(H -> H) -> MXU matmul, f32 accumulation
            x2 = jnp.dot(h, w_ctx, preferred_element_type=jnp.float32)
            x_new = jnp.tanh(x1_all[s] + x2)            # EUP
            if mask_tail:
                # Padded tail steps (global step >= T) must not advance the carry.
                x_new = jnp.where(c * TS + s < T_real, x_new, h)
            h = x_new
            xs_ref[s] = h                               # off the dependence chain
        x_ref[...] = h                                  # carry / final hidden state

        # Deferred out_layer: Linear(H -> 1) for the whole chunk as one lane reduction
        # (XLU), then a single small store per chunk.
        o = jnp.sum(xs_ref[...] * w_out_ref[...], axis=-1)   # (TS, 8)
        out_ref[0] = o

    return kernel


def elman_scan(u_seq, c0, w_in_t, w_ctx_t, w_out_row, ts=16):
    """Run T Elman steps in a single pallas_call.

    u_seq : (T, B, 1) drive sequence
    c0    : (B, H)    initial context
    w_in_t: (1, H), w_ctx_t: (H, H), w_out_row: (1, H)  (pre-transposed weights)
    Returns (outs (T, B, 1), x_final (B, H)).
    """
    T, B, _ = u_seq.shape
    H = c0.shape[1]

    BB = 8                                   # batch rows per block (sublane tile)
    B_pad = _round_up(B, BB)
    H_pad = _round_up(H, 128)
    nb = B_pad // BB

    TS = ts if T >= ts else T                # timesteps per grid iteration
    num_chunks = pl.cdiv(T, TS)
    T_pad = num_chunks * TS
    mask_tail = (T_pad != T)

    # Zero-padding keeps semantics exact: padded weight rows/cols are zero, so padded
    # hidden lanes stay tanh(0)=0 and contribute nothing to the matmul or the reduction;
    # padded tail timesteps are masked inside the kernel so the carry is untouched.
    u_p = jnp.pad(u_seq, ((0, T_pad - T), (0, B_pad - B), (0, 0)))
    c0_p = jnp.pad(c0, ((0, B_pad - B), (0, H_pad - H)))
    w_in_p = jnp.pad(w_in_t, ((0, 0), (0, H_pad - H)))
    w_ctx_p = jnp.pad(w_ctx_t, ((0, H_pad - H), (0, H_pad - H)))
    w_out_p = jnp.pad(w_out_row, ((0, 0), (0, H_pad - H)))

    out_pad, x_pad = pl.pallas_call(
        _make_chunk_kernel(TS, T, mask_tail),
        out_shape=(
            jax.ShapeDtypeStruct((nb, T_pad, BB), jnp.float32),   # per-chunk outputs
            jax.ShapeDtypeStruct((B_pad, H_pad), jnp.float32),    # final hidden state
        ),
        grid=(nb, num_chunks),
        in_specs=[
            pl.BlockSpec((TS, BB, 1), lambda b, c: (c, b, 0)),    # u: one chunk per step
            pl.BlockSpec((BB, H_pad), lambda b, c: (b, 0)),       # c0 (read at c == 0)
            pl.BlockSpec((1, H_pad), lambda b, c: (0, 0)),        # w_in: resident
            pl.BlockSpec((H_pad, H_pad), lambda b, c: (0, 0)),    # w_ctx: resident
            pl.BlockSpec((1, H_pad), lambda b, c: (0, 0)),        # w_out: resident
        ],
        out_specs=(
            pl.BlockSpec((1, TS, BB), lambda b, c: (b, c, 0)),    # chunk output block
            pl.BlockSpec((BB, H_pad), lambda b, c: (b, 0)),       # hidden carry / final x
        ),
        scratch_shapes=[pltpu.VMEM((TS, BB, H_pad), jnp.float32)],
        compiler_params=pltpu.CompilerParams(
            # batch blocks are independent -> "parallel" (megacore on v7x);
            # time chunks carry the hidden state -> must stay "arbitrary".
            dimension_semantics=("parallel", "arbitrary")),
    )(u_p, c0_p, w_in_p, w_ctx_p, w_out_p)

    # (nb, T_pad, BB) -> (T_pad, B_pad) -> (T, B, 1)
    outs = jnp.transpose(out_pad, (1, 0, 2)).reshape(T_pad, B_pad)[:T, :B][:, :, None]
    x_final = x_pad[:B, :H]
    return outs, x_final


def elman_forward(u, c, w_in_t, w_ctx_t, w_out_row):
    """Single-step forward with the exact semantics of Net.forward(u, c)."""
    outs, x = elman_scan(u[None], c, w_in_t, w_ctx_t, w_out_row)
    return outs[0], x                                            # (B, 1), (B, H)


if __name__ == "__main__":
    context_size = 30   # matches the module's global
    batch = 12          # B_pad = 16 -> two 8-row batch blocks (exercises the parallel axis)
    seq_len = 20        # not a multiple of TS=16 -> exercises the tail mask

    key = jax.random.PRNGKey(0)
    k_u, k_c, k_win, k_wctx, k_wout = jax.random.split(key, 5)

    # nn.Linear(bias=False) default init: U(-1/sqrt(fan_in), +1/sqrt(fan_in))
    bound_in = 1.0                           # fan_in = 1
    bound_h = 1.0 / jnp.sqrt(context_size)   # fan_in = context_size
    W_in = jax.random.uniform(k_win, (context_size, 1), jnp.float32, -bound_in, bound_in)
    W_ctx = jax.random.uniform(k_wctx, (context_size, context_size), jnp.float32,
                               -bound_h, bound_h)
    W_out = jax.random.uniform(k_wout, (1, context_size), jnp.float32, -bound_h, bound_h)

    # Drive sequence (T, B, 1) and initial context (B, H)
    u_seq = jax.random.normal(k_u, (seq_len, batch, 1), jnp.float32)
    c0 = jax.random.normal(k_c, (batch, context_size), jnp.float32)

    # Pre-transpose weights for the kernel (host-side glue)
    w_in_t = W_in.T          # (1, H)
    w_ctx_t = W_ctx.T        # (H, H)
    w_out_row = W_out        # (1, H)

    # ---- Single-step check (exact module semantics: forward(u, c) -> (out, x)) ----
    out1, x1 = elman_forward(u_seq[0], c0, w_in_t, w_ctx_t, w_out_row)
    out1, x1 = jax.block_until_ready((out1, x1))
    x1_ref = jnp.tanh(u_seq[0] @ W_in.T + c0 @ W_ctx.T)
    out1_ref = x1_ref @ W_out.T
    assert jnp.allclose(x1, x1_ref, atol=2e-4), "single-step hidden state mismatch"
    assert jnp.allclose(out1, out1_ref, atol=2e-4), "single-step output mismatch"

    # ---- Fused T-step recurrence in one pallas_call ----
    outs, x_final = elman_scan(u_seq, c0, w_in_t, w_ctx_t, w_out_row)
    outs, x_final = jax.block_until_ready((outs, x_final))

    # Pure-JAX reference scan
    c = c0
    outs_ref = []
    for t in range(seq_len):
        x = jnp.tanh(u_seq[t] @ W_in.T + c @ W_ctx.T)
        outs_ref.append(x @ W_out.T)
        c = x
    outs_ref = jnp.stack(outs_ref)
    assert jnp.allclose(outs, outs_ref, atol=2e-4), "scan outputs mismatch"
    assert jnp.allclose(x_final, c, atol=2e-4), "scan final hidden state mismatch"

    print("KERNEL_OK")
</pallas_src>

<mosaic_0001>
module attributes {stable_mosaic.version = 11 : i64} {
  func.func @kernel(%arg0: i32, %arg1: i32, %arg2: memref<1x8x1xf32, #tpu.memory_space<vmem>>, %arg3: memref<8x128xf32, #tpu.memory_space<vmem>>, %arg4: memref<1x128xf32, #tpu.memory_space<vmem>>, %arg5: memref<128x128xf32, #tpu.memory_space<vmem>>, %arg6: memref<1x128xf32, #tpu.memory_space<vmem>>, %arg7: memref<1x1x8xf32, #tpu.memory_space<vmem>>, %arg8: memref<8x128xf32, #tpu.memory_space<vmem>>, %arg9: memref<1x8x128xf32, #tpu.memory_space<vmem>>) attributes {dimension_semantics = [#tpu.dimension_semantics<parallel>, #tpu.dimension_semantics<arbitrary>], iteration_bounds = array<i64: 2, 1>, scalar_prefetch = 0 : i64, scratch_operands = 1 : i64, tpu.core_type = #tpu.core_type<tc>, window_params = [{transform_indices = @transform_0, window_bounds = array<i64: 1, 8, 1>}, {transform_indices = @transform_1, window_bounds = array<i64: 8, 128>}, {pipeline_mode = #tpu.pipeline_mode<synchronous>, transform_indices = @transform_2, window_bounds = array<i64: 1, 128>}, {pipeline_mode = #tpu.pipeline_mode<synchronous>, transform_indices = @transform_3, window_bounds = array<i64: 128, 128>}, {pipeline_mode = #tpu.pipeline_mode<synchronous>, transform_indices = @transform_4, window_bounds = array<i64: 1, 128>}, {transform_indices = @transform_5, window_bounds = array<i64: 1, 1, 8>}, {transform_indices = @transform_6, window_bounds = array<i64: 8, 128>}]} {
    %c0_i32 = arith.constant 0 : i32
    %0 = arith.cmpi eq, %arg1, %c0_i32 : i32
    %1 = arith.extui %0 : i1 to i32
    %c0_i32_0 = arith.constant 0 : i32
    %2 = arith.cmpi ne, %1, %c0_i32_0 : i32
    scf.if %2 {
      %c0_23 = arith.constant 0 : index
      %c0_24 = arith.constant 0 : index
      %28 = vector.load %arg3[%c0_23, %c0_24] : memref<8x128xf32, #tpu.memory_space<vmem>>, vector<8x128xf32>
      %c0_25 = arith.constant 0 : index
      %c0_26 = arith.constant 0 : index
      %29 = vector.load %arg8[%c0_25, %c0_26] : memref<8x128xf32, #tpu.memory_space<vmem>>, vector<8x128xf32>
      tpu.vector_store %arg8[%c0_25, %c0_26], %28 {strides = array<i32>} : memref<8x128xf32, #tpu.memory_space<vmem>>, vector<8x128xf32>,
    } else {
    }
    %c0 = arith.constant 0 : index
    %c0_1 = arith.constant 0 : index
    %3 = vector.load %arg4[%c0, %c0_1] : memref<1x128xf32, #tpu.memory_space<vmem>>, vector<1x128xf32>
    %c0_2 = arith.constant 0 : index
    %c0_3 = arith.constant 0 : index
    %4 = vector.load %arg5[%c0_2, %c0_3] : memref<128x128xf32, #tpu.memory_space<vmem>>, vector<128x128xf32>
    %c0_4 = arith.constant 0 : index
    %c0_5 = arith.constant 0 : index
    %c0_6 = arith.constant 0 : index
    %5 = vector.load %arg2[%c0_4, %c0_5, %c0_6] : memref<1x8x1xf32, #tpu.memory_space<vmem>>, vector<1x8x1xf32>
    %6 = vector.shape_cast %3 : vector<1x128xf32> to vector<1x1x128xf32>
    %7 = vector.broadcast %5 : vector<1x8x1xf32> to vector<1x8x128xf32>
    %8 = vector.broadcast %6 : vector<1x1x128xf32> to vector<1x8x128xf32>
    %9 = arith.mulf %7, %8 : vector<1x8x128xf32>
    %c0_7 = arith.constant 0 : index
    %c0_8 = arith.constant 0 : index
    %10 = vector.load %arg8[%c0_7, %c0_8] : memref<8x128xf32, #tpu.memory_space<vmem>>, vector<8x128xf32>
    %cst = arith.constant dense<0.000000e+00> : vector<8x128xf32>
    %11 = tpu.matmul %10, %4, %cst {dimension_numbers = #tpu.dot_dimension_numbers<[1], [0], [0], [1], [0, 0, 1, 1], [], []>} : vector<8x128xf32>, vector<128x128xf32>, vector<8x128xf32> -> vector<8x128xf32>
    %12 = vector.shape_cast %9 : vector<1x8x128xf32> to vector<8x128xf32>
    %13 = arith.addf %12, %11 : vector<8x128xf32>
    %14 = math.tanh %13 : vector<8x128xf32>
    %c0_9 = arith.constant 0 : index
    %c0_10 = arith.constant 0 : index
    %c0_11 = arith.constant 0 : index
    %15 = vector.load %arg9[%c0_9, %c0_10, %c0_11] : memref<1x8x128xf32, #tpu.memory_space<vmem>>, vector<1x8x128xf32>
    %16 = vector.shape_cast %15 : vector<1x8x128xf32> to vector<8x128xf32>
    %17 = vector.shape_cast %14 : vector<8x128xf32> to vector<1x8x128xf32>
    tpu.vector_store %arg9[%c0_9, %c0_10, %c0_11], %17 {strides = array<i32>} : memref<1x8x128xf32, #tpu.memory_space<vmem>>, vector<1x8x128xf32>,
    %c0_12 = arith.constant 0 : index
    %c0_13 = arith.constant 0 : index
    %18 = vector.load %arg8[%c0_12, %c0_13] : memref<8x128xf32, #tpu.memory_space<vmem>>, vector<8x128xf32>
    tpu.vector_store %arg8[%c0_12, %c0_13], %14 {strides = array<i32>} : memref<8x128xf32, #tpu.memory_space<vmem>>, vector<8x128xf32>,
    %c0_14 = arith.constant 0 : index
    %c0_15 = arith.constant 0 : index
    %c0_16 = arith.constant 0 : index
    %19 = vector.load %arg9[%c0_14, %c0_15, %c0_16] : memref<1x8x128xf32, #tpu.memory_space<vmem>>, vector<1x8x128xf32>
    %c0_17 = arith.constant 0 : index
    %c0_18 = arith.constant 0 : index
    %20 = vector.load %arg6[%c0_17, %c0_18] : memref<1x128xf32, #tpu.memory_space<vmem>>, vector<1x128xf32>
    %21 = vector.shape_cast %20 : vector<1x128xf32> to vector<1x1x128xf32>
    %22 = vector.broadcast %21 : vector<1x1x128xf32> to vector<1x8x128xf32>
    %23 = arith.mulf %19, %22 : vector<1x8x128xf32>
    %cst_19 = arith.constant dense<0.000000e+00> : vector<1x8xf32>
    %24 = vector.multi_reduction <add>, %23, %cst_19 [2] : vector<1x8x128xf32> to vector<1x8xf32>
    %c0_20 = arith.constant 0 : index
    %c0_21 = arith.constant 0 : index
    %c0_22 = arith.constant 0 : index
    %25 = vector.load %arg7[%c0_20, %c0_21, %c0_22] : memref<1x1x8xf32, #tpu.memory_space<vmem>>, vector<1x1x8xf32>
    %26 = vector.shape_cast %25 : vector<1x1x8xf32> to vector<1x8xf32>
    %27 = vector.shape_cast %24 : vector<1x8xf32> to vector<1x1x8xf32>
    tpu.vector_store %arg7[%c0_20, %c0_21, %c0_22], %27 {strides = array<i32>} : memref<1x1x8xf32, #tpu.memory_space<vmem>>, vector<1x1x8xf32>,
    return
  }
  func.func @transform_0(%arg0: i32, %arg1: i32) -> (i32, i32, i32) {
    %c0_i32 = arith.constant 0 : i32
    %c0_i32_0 = arith.constant 0 : i32
    return %arg1, %arg0, %c0_i32 : i32, i32, i32
  }
  func.func @transform_1(%arg0: i32, %arg1: i32) -> (i32, i32) {
    %c0_i32 = arith.constant 0 : i32
    %c0_i32_0 = arith.constant 0 : i32
    return %arg0, %c0_i32 : i32, i32
  }
  func.func @transform_2(%arg0: i32, %arg1: i32) -> (i32, i32) {
    %c0_i32 = arith.constant 0 : i32
    %c0_i32_0 = arith.constant 0 : i32
    %c0_i32_1 = arith.constant 0 : i32
    return %c0_i32, %c0_i32_0 : i32, i32
  }
  func.func @transform_3(%arg0: i32, %arg1: i32) -> (i32, i32) {
    %c0_i32 = arith.constant 0 : i32
    %c0_i32_0 = arith.constant 0 : i32
    %c0_i32_1 = arith.constant 0 : i32
    return %c0_i32, %c0_i32_0 : i32, i32
  }
  func.func @transform_4(%arg0: i32, %arg1: i32) -> (i32, i32) {
    %c0_i32 = arith.constant 0 : i32
    %c0_i32_0 = arith.constant 0 : i32
    %c0_i32_1 = arith.constant 0 : i32
    return %c0_i32, %c0_i32_0 : i32, i32
  }
  func.func @transform_5(%arg0: i32, %arg1: i32) -> (i32, i32, i32) {
    %c0_i32 = arith.constant 0 : i32
    %c0_i32_0 = arith.constant 0 : i32
    return %arg0, %arg1, %c0_i32 : i32, i32, i32
  }
  func.func @transform_6(%arg0: i32, %arg1: i32) -> (i32, i32) {
    %c0_i32 = arith.constant 0 : i32
    %c0_i32_0 = arith.constant 0 : i32
    return %arg0, %c0_i32 : i32, i32
  }
}

</mosaic_0001>

<bundles_post_ra>
// kernel: tpu_custom_call.1
= control target key start
LH: loop header
LB: loop body
LE: loop exit
PB: predicated region body
PF: predicated region fallthrough
CT: control target
= control target key end

     0   :  { %12 = vsyncpa [#allocation4], 0  ;;  %s1163_s0 = inlined_call_operand.vmem [shape: f32[1,16,1], index: 0, kind: input, shape index: {}]   ;;  %s1164_s1 = inlined_call_operand.vmem [shape: f32[16,128], index: 1, kind: input, shape index: {}]   ;;  %s1165_s2 = inlined_call_operand.vmem [shape: f32[1,128], index: 2, kind: input, shape index: {}]   ;;  %s1166_s3 = inlined_call_operand.hbm [shape: f32[128,128], index: 3, kind: input, shape index: {}]   ;;  %s1167_s4 = inlined_call_operand.vmem [shape: f32[1,128], index: 4, kind: input, shape index: {}]   ;;  %s1168_s5 = inlined_call_operand.hbm [shape: f32[2,1,8], index: 5, kind: output, shape index: {0}]   ;;  %s1169_s6 = inlined_call_operand.hbm [shape: f32[16,128], index: 6, kind: output, shape index: {1}]  }
   0x1   :  { %13 = vsyncpa [#allocation5], 0 }
   0x2   :  { %15 = vsyncpa [#allocation5 + $0x1], 0 }
   0x3   :  { %16 = vsyncpa [#allocation8], 0 }
   0x4   :  { %18 = vsyncpa [#allocation8 + $0x1], 0  ;;  %s968_s21 = smov 0   ;;  %s970_s22 = smov 0  }
   0x5   :  { %s972_s23 = smov 0   ;;  %s974_s24 = smov 0  }
   0x6   :  { %s976_s25 = smov 0   ;;  %s978_s26 = smov 0  }
   0x7 LB: > { %s607_s27 = sadd.s32 4294967295, %s922_s26   ;;  %s608_s28 = sadd.s32 4294967294, %s922_s26   ;;  %s922_s26 = sphi %s978_s26, %s24_s26   ;;  %s918_s25 = sphi %s976_s25, %s1187_s25   ;;  %s914_s24 = sphi %s974_s24, %s1186_s24   ;;  %s910_s23 = sphi %s972_s23, %s1185_s23   ;;  %s906_s22 = sphi %s970_s22, %s1184_s22   ;;  %s902_s21 = sphi %s968_s21, %s1183_s21  }
   0x8   : > { %s36_s29 = sadd.s32 1, %s918_s25  ;;  %s162_s30 = sadd.s32 1, %s910_s23 }
   0x9   : > { %p38_p0 = scmp.ge.s32.totalorder %s36_s29, 2  ;;  %p172_p1 = scmp.ne.s32.totalorder %s910_s23, %s906_s22 }
   0xa   : > { %p173_p2 = scmp.eq.s32.totalorder %s607_s27, 1  ;;  %p178_p3 = scmp.ne.s32.totalorder %s906_s22, %s902_s21 }
   0xb   : > { %s1189_s29 = smov (%p38_p0, %s36_s29), 0  ;;  %p179_p5 = scmp.eq.s32.totalorder %s608_s28, 1 }
   0xc   : > { %p1008_p4 = por %p173_p2, %p172_p1  ;;  %s157_s8 = ssub.s32 %s918_s25, %s1189_s29 }
   0xd   : > { %p609_p6 = scmp.ge.s32.totalorder %s922_s26, 1  ;;  %p160_p7 = scmp.eq.s32.totalorder %s157_s8, 0 }
   0xe   : > { %s1174_s7 = scalar_select %p1008_p4, 1, 0 }
   0xf   : > { %p1015_p8 = por %p179_p5, %p178_p3  ;;  %p212_p9 = scmp.lt.s32.totalorder %s922_s26, 3 }
  0x10   : > { %s1021_s10 = scalar_select %p160_p7, %s910_s23, %s162_s30  }
  0x11   : > { %s1175_s9 = scalar_select %p1015_p8, 1, 0 }
  0x12   : > { %p1023_p10 = pnand %p609_p6, %p212_p9  ;;  %p1027_p11 = scmp.eq.s32.totalorder %s607_s27, 0 }
  0x13   : > { %s924_s13 = smov [#allocation3]   ;;  %s780_s18 = scalar_lea.hbm %s1166_s3, 2048 }
  0x14   : > { %s1176_s11 = scalar_select %p1023_p10, 1, 0 }
  0x15   : > { %s1177_s12 = scalar_select %p1027_p11, 1, 0 }
  0x16   : > { %p708_p12 = pneg %p1023_p10  ;;  %s227_s14 = sshll.u32 %s924_s13, 4  ;;  %s228_s14 = int_to_ptr.vmem [resolvable:$true] %s227_s14 }
  0x17   : > { %p781_p0 = scmp.ne.s32.totalorder %s1166_s3, %s780_s18  ;;  %p787_p5 = scmp.lt.u32.totalorder %s780_s18, %s1166_s3 }
  0x18   : > { %p1035_p13 = pnand %p1027_p11, %p708_p12 }
  0x1a   : > { %p782_p1 = pneg %p1035_p13 }
  0x1c   : > { %p783_p2 = pnand %p782_p1, %p781_p0 }
  0x1e   : > { %p784_p3 = pneg %p783_p2 }
  0x20   : > { %p789_p6 = pnand %p787_p5, %p784_p3 }
  0x22   : > { %792 = shalt.err (!%p789_p6)
}
  0x23   : > { %s793_s30 = scalar_lea.vmem %s228_s14, 2048  ;;  %p801_p8 = scmp.lt.s32.totalorder %s228_s14, %s228_s14 }
  0x24   : > { %p794_p7 = scmp.ne.s32.totalorder %s228_s14, %s793_s30  ;;  %p802_p4 = scmp.lt.s32.totalorder %s793_s30, %s793_s30 }
  0x26   : > { %p796_p9 = pnand %p794_p7, %p782_p1  ;;  %p803_p11 = por %p802_p4, %p801_p8 }
  0x28   : > { %p797_p12 = pneg %p796_p9 }
  0x2a   : > { %p804_p10 = pnand %p803_p11, %p797_p12 }
  0x2c   : > { %807 = shalt.err (!%p804_p10)
}
  0x2d   : > { %s925_s8 = smov 128   ;;  %s926_s13 = smov 8  }
  0x2e   : > { %711 = dma.hbm_to_vmem [thread:$0]  (!%p1035_p13), %s1166_s3, 2048, %s228_s14, [#allocation4], %s925_s8, %s925_s8, %s926_s13  }
  0x2f   : > { %p1179_p0 = scmp.ne.s32.totalorder %s1176_s11, 0 }
  0x30   : > { %p1180_p2 = scmp.ne.s32.totalorder (!%p1179_p0), %s1177_s12, 0 }
  0x31   : > { %264 = sbr.rel (%p1179_p0) target bundleno = 477 (0x1dd), region = 40 }
  0x38   : > { %889 = dma.done.wait (%p1180_p2), [#allocation4], 2048  }
  0x39   : > { %891 = vsyncadd (%p1180_p2), [#allocation4], 4294965248  ;;  %v927_v0 = vmov 0.0|0.0   ;;  %vm928_vm0 = vmmov 0   ;;  %v929_v1 = vmov 0.0   ;;  %p307_p4 = scmp.lt.s32.totalorder %s914_s24, 1 }
  0x3a   : > { %676 = vmatprep.subr.bf16.mxu0 %v927_v0  ;;  %673 = vmatprep.mubr.msk.f32.mxu0 %vm928_vm0, %v929_v1  ;;  %v930_v2 = vmov 0   ;;  %v324_v3 = vld [vmem:[#allocation3] sm:$0xff]  ;;  %v325_v4 = vld [vmem:[#allocation3 + $0x8] sm:$0xff]  ;;  %v326_v5 = vld [vmem:[#allocation3 + $0x10] sm:$0xff]  ;;  %s1080_s8 = sand.u32 1, %s906_s22   ;;  %p1181_p10 = scmp.ne.s32.totalorder %s1174_s7, 0 }
  0x3b   : > { %777 = vset.pattern.permute.xlu0 %v930_v2  ;;  %s1063_s14 = scalar_select %p307_p4, %s914_s24, 1  ;;  %v677_v6 = vpack.c.bf16 %v325_v4, %v324_v3  ;;  %v327_v7 = vld [vmem:[#allocation3 + $0x18] sm:$0xff]  ;;  %v328_v9 = vld [vmem:[#allocation3 + $0x20] sm:$0xff]  ;;  %v329_v10 = vld [vmem:[#allocation3 + $0x28] sm:$0xff] }
  0x3c   : > { %v680_v8 = vpack.c.bf16 %v327_v7, %v326_v5  ;;  %v683_v12 = vpack.c.bf16 %v329_v10, %v328_v9  ;;  %v330_v13 = vld [vmem:[#allocation3 + $0x30] sm:$0xff]  ;;  %v331_v14 = vld [vmem:[#allocation3 + $0x38] sm:$0xff]  ;;  %v332_v16 = vld [vmem:[#allocation3 + $0x40] sm:$0xff]  ;;  %s614_s13 = sshll.u32 %s1080_s8, 3  ;;  %s454_s20 = scalar_lea.sflag [#allocation8], %s1080_s8 }
  0x3d   : > { %s615_s11 = sshll.u32 %s1063_s14, 3  ;;  %678 = vmatpush3.bf16.msra.mxu0 %v677_v6  ;;  %v686_v15 = vpack.c.bf16 %v331_v14, %v330_v13  ;;  %v333_v17 = vld [vmem:[#allocation3 + $0x48] sm:$0xff]  ;;  %v334_v19 = vld [vmem:[#allocation3 + $0x50] sm:$0xff]  ;;  %v335_v20 = vld [vmem:[#allocation3 + $0x58] sm:$0xff]  ;;  %s304_s14 = scalar_lea.vmem [#allocation7], %s614_s13 }
  0x3e   : > { %s312_s18 = scalar_lea.vmem %s1163_s0, %s615_s11  ;;  %679 = vmatprep.subr.bf16.mxu0 %v927_v0  ;;  %v689_v18 = vpack.c.bf16 %v333_v17, %v332_v16  ;;  %v692_v21 = vpack.c.bf16 %v335_v20, %v334_v19  ;;  %v336_v22 = vld [vmem:[#allocation3 + $0x60] sm:$0xff]  ;;  %v337_v23 = vld [vmem:[#allocation3 + $0x68] sm:$0xff]  ;;  %v338_v25 = vld [vmem:[#allocation3 + $0x70] sm:$0xff]  ;;  %s316_s27 = scalar_lea.vmem %s1164_s1, %s615_s11 }
  0x3f   : > { %v340_v11 = vld [vmem:[%s312_s18] sm:$0xff]  ;;  %v695_v24 = vpack.c.bf16 %v337_v23, %v336_v22  ;;  %v339_v26 = vld [vmem:[#allocation3 + $0x78] sm:$0xff]  ;;  %s621_s11 = sshll.u32 %s914_s24, 7  ;;  %s481_s12 = sshll.u32 %s304_s14, 4  ;;  %s482_s12 = int_to_ptr.vmem [resolvable:$true] %s481_s12 }
  0x40   : > { %343 = vperm.xlu0 %777, %v340_v11   ;;  %v698_v27 = vpack.c.bf16 %v339_v26, %v338_v25  ;;  %v321_v28 = vld [vmem:[%s316_s27] sm:$0xff]  ;;  %s1090_s19 = scalar_lea.hbm %s1169_s6, %s621_s11  ;;  %s808_s27 = scalar_lea.vmem %s482_s12, 128 }
  0x41   : > { %681 = vmatpush3.bf16.msra.mxu0 %v680_v8  ;;  %v617_v30 = vld [vmem:[%s1165_s2] ss:$0 sm:$0xff]  ;;  %p809_p8 = scmp.ne.s32.totalorder %s482_s12, %s808_s27  ;;  %s931_s28 = smov [#allocation7]  }
  0x42   : > { %682 = vmatprep.subr.bf16.mxu0 %v927_v0  ;;  %v618_v35 = vld [vmem:[%s1167_s4] ss:$0 sm:$0xff]  ;;  %s812_s30 = sshll.u32 %s931_s28, 4  ;;  %s813_s30 = int_to_ptr.vmem [resolvable:$false] %s812_s30 }
  0x43   : > { %p810_p11 = pnand %p809_p8, %p1181_p10  ;;  %s814_s13 = scalar_lea.vmem %s813_s30, 256 }
  0x44   : > { %p815_p1 = scmp.lt.s32.totalorder %s482_s12, %s813_s30  ;;  %p816_p3 = scmp.lt.s32.totalorder %s814_s13, %s808_s27 }
  0x45   : > { %684 = vmatpush3.bf16.msra.mxu0 %v683_v12  ;;  %p811_p13 = pneg %p810_p11 }
  0x46   : > { %685 = vmatprep.subr.bf16.mxu0 %v927_v0  ;;  %p817_p5 = por %p816_p3, %p815_p1 }
  0x48   : > { %p818_p6 = pnand %p817_p5, %p811_p13 }
  0x49   : > { %687 = vmatpush3.bf16.msra.mxu0 %v686_v15 }
  0x4a   : > { %688 = vmatprep.subr.bf16.mxu0 %v927_v0 }
  0x4d   : > { %690 = vmatpush3.bf16.msra.mxu0 %v689_v18 }
  0x4e   : > { %691 = vmatprep.subr.bf16.mxu0 %v927_v0 }
  0x51   : > { %693 = vmatpush3.bf16.msra.mxu0 %v692_v21 }
  0x52   : > { %694 = vmatprep.subr.bf16.mxu0 %v927_v0 }
  0x55   : > { %696 = vmatpush3.bf16.msra.mxu0 %v695_v24 }
  0x56   : > { %697 = vmatprep.subr.bf16.mxu0 %v927_v0 }
  0x59   : > { %699 = vmatpush3.bf16.msra.mxu0 %v698_v27 }
  0x5c   : > { %674 = vmatmul.mubr.f32.vlgmr.msra.gmra.mrb[0].mxu0 %v321_v28 }
  0xbf   : > { %v344_v29 = vpop.permute.xlu0 %343 }
  0xc0   : > { %v352_v31 = vmul.f32 %v617_v30, %v344_v29 }
 0x12f   : > { %v420_v32 = vpop.f32.mrb[0].mxu0 }
 0x130   : > { %v424_v33 = vadd.f32 %v420_v32, %v352_v31  ;;  %v675_v34 = vpop.f32.mrb[1].mxu0 }
 0x132   : > { %778 = vtanh.f32 %v424_v33 }
 0x13c   : > { %v779_v36 = vpop.eup %778 }
 0x13d   : > { %427 = vst [vmem:[%s304_s14] sm:$0xff] %v779_v36  ;;  %v436_v37 = vmul.f32 %v779_v36, %v618_v35 }
 0x13f   : > { %437 = vadd.xlane.f32.xlu0 %v436_v37 }
 0x140   : > { %821 = shalt.err (!%p818_p6)
}
 0x141   : > { %s822_s16 = scalar_lea.hbm %s1090_s19, 128  ;;  %s826_s11 = scalar_lea.hbm %s1169_s6, 256 }
 0x142   : > { %p823_p7 = scmp.ne.s32.totalorder %s1090_s19, %s822_s16  ;;  %p827_p0 = scmp.lt.u32.totalorder %s1090_s19, %s1169_s6 }
 0x143   : > { %p828_p2 = scmp.lt.u32.totalorder %s826_s11, %s822_s16  ;;  %p830_p8 = scmp.lt.u32.totalorder %s822_s16, %s1090_s19 }
 0x144   : > { %p824_p9 = pnand %p823_p7, %p1181_p10 }
 0x145   : > { %p829_p4 = por %p828_p2, %p827_p0 }
 0x146   : > { %p825_p12 = pneg %p824_p9 }
 0x147   : > { %p831_p11 = por %p830_p8, %p829_p4 }
 0x149   : > { %p832_p13 = pnand %p831_p11, %p825_p12 }
 0x14b   : > { %835 = shalt.err (!%p832_p13)
}
 0x14c   : > { %705 = dma.vmem_to_hbm [thread:$0]  (%p1181_p10), %s482_s12, 128, %s1090_s19, %s454_s20   ;;  %v440_v38 = vlaneseq  ;;  %vm447_vm1 = vcmask 57344  }
 0x14d   : > { %s620_s27 = sshll.u32 %s914_s24, 4  ;;  %s297_s28 = scalar_lea.vmem [#allocation6], %s1080_s8 }
 0x14e   : > { %v441_v39 = vand.u32 127, %v440_v38  ;;  %v443_v40 = vshrl.u32 %v440_v38, 7  ;;  %s468_s30 = sshll.u32 %s297_s28, 4  ;;  %s1115_s17 = scalar_lea.hbm %s1168_s5, %s620_s27  ;;  %s1117_s30 = int_to_ptr.vmem [resolvable:$true] %s468_s30 }
 0x14f   : > { %s450_s12 = scalar_lea.sflag [#allocation5], %s1080_s8  ;;  %s836_s19 = scalar_lea.vmem %s1117_s30, 16 }
 0x150   : > { %v444_v41 = vsub.s32 %v441_v39, %v443_v40  ;;  %p837_p1 = scmp.ne.s32.totalorder %s1117_s30, %s836_s19  ;;  %s932_s24 = smov [#allocation6]  }
 0x151   : > { %s840_s20 = sshll.u32 %s932_s24, 4  ;;  %s841_s20 = int_to_ptr.vmem [resolvable:$false] %s840_s20 }
 0x152   : > { %p838_p3 = pnand %p837_p1, %p1181_p10  ;;  %s842_s14 = scalar_lea.vmem %s841_s20, 32 }
 0x153   : > { %p843_p6 = scmp.lt.s32.totalorder %s1117_s30, %s841_s20  ;;  %p844_p7 = scmp.lt.s32.totalorder %s842_s14, %s836_s19 }
 0x154   : > { %p839_p5 = pneg %p838_p3 }
 0x155   : > { %p845_p9 = por %p844_p7, %p843_p6 }
 0x157   : > { %p846_p12 = pnand %p845_p9, %p839_p5 }
 0x1cc   : > { %v438_v42 = vpop.xlane.xlu0 %437 }
 0x1cd   : > { %v445_v43 = vrot.slane %v438_v42, %v444_v41 }
 0x1cf   : > { %448 = vst.msk [vmem:[%s297_s28] sm:$0x1] %vm447_vm1, %v445_v43 }
 0x1d0   : > { %849 = shalt.err (!%p846_p12)
}
 0x1d1   : > { %s850_s8 = scalar_lea.hbm %s1115_s17, 16  ;;  %s854_s18 = scalar_lea.hbm %s1168_s5, 32 }
 0x1d2   : > { %p851_p0 = scmp.ne.s32.totalorder %s1115_s17, %s850_s8  ;;  %p855_p8 = scmp.lt.u32.totalorder %s1115_s17, %s1168_s5 }
 0x1d3   : > { %p856_p11 = scmp.lt.u32.totalorder %s854_s18, %s850_s8  ;;  %p858_p1 = scmp.lt.u32.totalorder %s850_s8, %s1115_s17 }
 0x1d4   : > { %p852_p2 = pnand %p851_p0, %p1181_p10 }
 0x1d5   : > { %p857_p13 = por %p856_p11, %p855_p8 }
 0x1d6   : > { %p853_p4 = pneg %p852_p2 }
 0x1d7   : > { %p859_p3 = por %p858_p1, %p857_p13 }
 0x1d9   : > { %p860_p5 = pnand %p859_p3, %p853_p4 }
 0x1db   : > { %863 = shalt.err (!%p860_p5)
}
 0x1dc   : > { %704 = dma.vmem_to_hbm [thread:$0]  (%p1181_p10), %s1117_s30, 16, %s1115_s17, %s450_s12  }
 0x1dd PF: > { %p721_p6 = scmp.ge.s32.totalorder %s922_s26, 2  ;;  %s493_s13 = sand.u32 1, %s902_s21  }
 0x1de   : > { %p1182_p7 = scmp.ne.s32.totalorder %s1175_s9, 0  ;;  %s494_s16 = scalar_lea.sflag [#allocation5], %s493_s13 }
 0x1e0   : > { %p713_p9 = pnand %p721_p6, %p1182_p7 }
 0x1e2   : > { %893 = dma.done.wait (!%p713_p9), %s494_s16, 16  }
 0x1e3   : > { %895 = vsyncadd (!%p713_p9), %s494_s16, 4294967280  ;;  %s502_s19 = scalar_lea.sflag [#allocation8], %s493_s13 }
 0x1e4   : > { %897 = dma.done.wait (!%p713_p9), %s502_s19, 128  }
 0x1e5   : > { %899 = vsyncadd (!%p713_p9), %s502_s19, 4294967168  ;;  %s24_s26 = sadd.s32 1, %s922_s26   ;;  %s1183_s21 = smov %s906_s22 }
 0x1e6   : > { %p21_p12 = scmp.ge.s32.totalorder %s24_s26, 4   ;;  %s1184_s22 = smov %s910_s23 }
 0x1e7   : > { %s1185_s23 = smov %s1021_s10  ;;  %s1186_s24 = smov %s918_s25 }
 0x1e8   : > { %s1187_s25 = smov %s1189_s29  ;;  %23 = sbr.rel (!%p21_p12) target bundleno = 7 (0x7), region = 104 }
 0x1ef   :  { %507 = vsyncpa [#allocation4], 1 }
 0x1f0   :  { %509 = vsyncpa [#allocation4 + $0x1], 1 }
 0x1f1   :  { %510 = vsyncpa [#allocation5], 1 }
 0x1f2   :  { %512 = vsyncpa [#allocation5 + $0x1], 1 }
 0x1f3   :  { %513 = vsyncpa [#allocation8], 1 }
 0x1f4   :  { %515 = vsyncpa [#allocation8 + $0x1], 1 }

</bundles_post_ra>
